<compile_context>
chip_gen: v6e
topology: v6e:2x2x1
jax: 0.10.0
libtpu: 0.0.40
codegen_flags: <defaults>
</compile_context>

<pallas_src>
import math

import jax
import jax.numpy as jnp
from jax.experimental import pallas as pl
from jax.experimental.pallas import tpu as pltpu  # noqa: F401  (kept for CompilerParams knobs at larger sizes)


def _make_kernel(nhead: int, n: int, l: int, s_len: int, eps: float = 1e-5):
    def kernel(q_ref, k_ref, mb_ref,
               wq_ref, wkv_ref, wo_ref, w1_ref, w2_ref,
               vec_ref, bkv_ref, b1_ref,
               src_ref, attn_ref):
        X = q_ref[...]                        # (N*L, E)  flattened query batch
        Kx = k_ref[...]                       # (N*S, E)  flattened key batch
        mb = mb_ref[...]                      # (N, 1, S) additive key_padding_mask bias

        vec = vec_ref[...]                    # (7, E): bq, bo, b2, g1, be1, g2, be2
        bq, bo, b2 = vec[0:1], vec[1:2], vec[2:3]
        g1, be1, g2, be2 = vec[3:4], vec[4:5], vec[5:6], vec[6:7]

        E = X.shape[-1]
        d = E // nhead
        scale = 1.0 / math.sqrt(d)

        # ---- fused input projections on the flattened batch (MXU) ----
        q = jnp.dot(X, wq_ref[...], preferred_element_type=jnp.float32) + bq       # (N*L, E)
        q = q * scale                                                               # fold 1/sqrt(d) once
        kv = jnp.dot(Kx, wkv_ref[...], preferred_element_type=jnp.float32) + bkv_ref[...]  # (N*S, 2E)
        k = kv[:, :E]
        v = kv[:, E:]

        # leading-dim reshapes only (lane dim unchanged): cheap
        q3 = q.reshape(n, l, E)
        k3 = k.reshape(n, s_len, E)
        v3 = v.reshape(n, s_len, E)

        wo = wo_ref[...]                                                            # (E, E)
        mbf = jnp.broadcast_to(mb, (n, l, s_len))                                   # hoisted broadcast

        attn_acc = jnp.zeros((n, l, s_len), jnp.float32)
        attn_out = jnp.zeros((n * l, E), jnp.float32)
        for h in range(nhead):                       # small static unroll; N batched inside
            sl = slice(h * d, (h + 1) * d)
            qh = q3[..., sl]                         # (N, L, d)
            kh = k3[..., sl]                         # (N, S, d)
            vh = v3[..., sl]                         # (N, S, d)
            s = jnp.einsum('nld,nsd->nls', qh, kh,
                           preferred_element_type=jnp.float32) + mbf               # (N, L, S)
            m = jnp.max(s, axis=-1, keepdims=True)
            e = jnp.exp(s - m)
            p = e * pl.reciprocal(jnp.sum(e, axis=-1, keepdims=True), approx=True)  # softmax (EUP recip)
            attn_acc = attn_acc + p
            ctx = jnp.einsum('nls,nsd->nld', p, vh,
                             preferred_element_type=jnp.float32)                    # (N, L, d)
            # fold output projection into the head loop: sum_h ctx_h @ Wo[h*d:(h+1)*d, :]
            attn_out = attn_out + jnp.dot(ctx.reshape(n * l, d), wo[sl, :],
                                          preferred_element_type=jnp.float32)

        attn_ref[...] = attn_acc * (1.0 / nhead)     # heads averaged (PyTorch default)
        attn_out = attn_out + bo

        # ---- residual + layernorm 1 ----
        x = X + attn_out
        mu = jnp.mean(x, axis=-1, keepdims=True)
        var = jnp.mean((x - mu) ** 2, axis=-1, keepdims=True)
        x = (x - mu) * jax.lax.rsqrt(var + eps) * g1 + be1

        # ---- feed-forward ----
        h1 = jnp.maximum(jnp.dot(x, w1_ref[...], preferred_element_type=jnp.float32)
                         + b1_ref[...], 0.0)
        ff = jnp.dot(h1, w2_ref[...], preferred_element_type=jnp.float32) + b2

        # ---- residual + layernorm 2 ----
        y = x + ff
        mu2 = jnp.mean(y, axis=-1, keepdims=True)
        var2 = jnp.mean((y - mu2) ** 2, axis=-1, keepdims=True)
        y = (y - mu2) * jax.lax.rsqrt(var2 + eps) * g2 + be2

        src_ref[...] = y
    return kernel


def attention_forward(Q, K, mask, params, nhead):
    """Q: (L, N, E), K: (S, N, E), mask: (N, S) bool (True = padded key).
    Returns (src (L, N, E), attn (N, L, S))."""
    L, N, E = Q.shape
    S = K.shape[0]

    # Flatten batch for the batch-independent matmuls (host-side layout plumbing).
    Qf = jnp.transpose(Q, (1, 0, 2)).reshape(N * L, E)          # (N*L, E)
    Kf = jnp.transpose(K, (1, 0, 2)).reshape(N * S, E)          # (N*S, E)
    mask_bias = jnp.where(mask, -1e9, 0.0).astype(jnp.float32).reshape(N, 1, S)

    # Fuse the two K-side projection weights; pack the small per-layer vectors.
    # (In a real model these concatenations would be precomputed once.)
    wkv = jnp.concatenate([params["wk"], params["wv"]], axis=1)  # (E, 2E)
    bkv = jnp.concatenate([params["bk"], params["bv"]], axis=1)  # (1, 2E)
    vec = jnp.concatenate([params["bq"], params["bo"], params["b2"],
                           params["g1"], params["be1"],
                           params["g2"], params["be2"]], axis=0)  # (7, E)

    out_shape = [
        jax.ShapeDtypeStruct((N * L, E), jnp.float32),   # src (flattened batch)
        jax.ShapeDtypeStruct((N, L, S), jnp.float32),    # attn (head-averaged)
    ]
    # Single gridless invocation: whole arrays land in VMEM, no per-step overhead.
    src_flat, attn = pl.pallas_call(
        _make_kernel(nhead, N, L, S),
        out_shape=out_shape,
    )(Qf, Kf, mask_bias,
      params["wq"], wkv, params["wo"], params["w1"], params["w2"],
      vec, bkv, params["b1"])

    src = src_flat.reshape(N, L, E).transpose(1, 0, 2)           # back to (L, N, E)
    return src, attn


def reference_forward(Q, K, mask, params, nhead, eps=1e-5):
    """Pure-JAX reference mirroring nn.MultiheadAttention + FFN (eval mode)."""
    L, N, E = Q.shape
    S = K.shape[0]
    d = E // nhead
    scale = 1.0 / math.sqrt(d)
    Qb = jnp.transpose(Q, (1, 0, 2))
    Kb = jnp.transpose(K, (1, 0, 2))
    q = Qb @ params["wq"] + params["bq"]
    k = Kb @ params["wk"] + params["bk"]
    v = Kb @ params["wv"] + params["bv"]
    qh = q.reshape(N, L, nhead, d).transpose(0, 2, 1, 3)
    kh = k.reshape(N, S, nhead, d).transpose(0, 2, 1, 3)
    vh = v.reshape(N, S, nhead, d).transpose(0, 2, 1, 3)
    s = jnp.einsum("nhld,nhsd->nhls", qh, kh) * scale
    s = s + jnp.where(mask, -1e9, 0.0)[:, None, None, :]
    p = jax.nn.softmax(s, axis=-1)
    ctx = jnp.einsum("nhls,nhsd->nhld", p, vh).transpose(0, 2, 1, 3).reshape(N, L, E)
    attn_out = ctx @ params["wo"] + params["bo"]

    def ln(x, g, b):
        mu = jnp.mean(x, -1, keepdims=True)
        var = jnp.mean((x - mu) ** 2, -1, keepdims=True)
        return (x - mu) * jax.lax.rsqrt(var + eps) * g + b

    x = ln(Qb + attn_out, params["g1"], params["be1"])
    ff = jnp.maximum(x @ params["w1"] + params["b1"], 0.0) @ params["w2"] + params["b2"]
    y = ln(x + ff, params["g2"], params["be2"])
    return jnp.transpose(y, (1, 0, 2)), p.mean(axis=1)


if __name__ == "__main__":
    # Small shapes consistent with the module
    input_dim, nhead, dim_ff = 32, 4, 64
    L, S, N = 8, 8, 2

    key = jax.random.PRNGKey(0)
    ks = jax.random.split(key, 16)

    def init_w(k, shape, fan_in):
        lim = 1.0 / math.sqrt(fan_in)
        return jax.random.uniform(k, shape, jnp.float32, -lim, lim)

    E, F = input_dim, dim_ff
    # weights stored (in, out) for right-multiplication
    params = {
        "wq": init_w(ks[0], (E, E), E), "bq": jnp.zeros((1, E), jnp.float32),
        "wk": init_w(ks[1], (E, E), E), "bk": jnp.zeros((1, E), jnp.float32),
        "wv": init_w(ks[2], (E, E), E), "bv": jnp.zeros((1, E), jnp.float32),
        "wo": init_w(ks[3], (E, E), E), "bo": init_w(ks[4], (1, E), E),
        "w1": init_w(ks[5], (E, F), E), "b1": init_w(ks[6], (1, F), E),
        "w2": init_w(ks[7], (F, E), F), "b2": init_w(ks[8], (1, E), F),
        "g1": jnp.ones((1, E), jnp.float32), "be1": jnp.zeros((1, E), jnp.float32),
        "g2": jnp.ones((1, E), jnp.float32), "be2": jnp.zeros((1, E), jnp.float32),
    }

    Q = jax.random.normal(ks[9], (L, N, E), jnp.float32)
    K = jax.random.normal(ks[10], (S, N, E), jnp.float32)
    # key_padding_mask: True = ignore this key position
    mask = jnp.zeros((N, S), jnp.bool_).at[1, S - 2:].set(True)

    src, attn = attention_forward(Q, K, mask, params, nhead)
    src, attn = jax.block_until_ready(src), jax.block_until_ready(attn)

    src_ref, attn_ref = reference_forward(Q, K, mask, params, nhead)
    assert src.shape == (L, N, E) and attn.shape == (N, L, S)
    # slightly relaxed tolerance: softmax uses the EUP approx reciprocal
    assert jnp.allclose(src, src_ref, atol=2e-3, rtol=2e-3)
    assert jnp.allclose(attn, attn_ref, atol=2e-3, rtol=2e-3)

    print("KERNEL_OK")
</pallas_src>

<mosaic_0001>
module attributes {stable_mosaic.version = 11 : i64} {
  func.func @kernel(%arg0: memref<16x32xf32, #tpu.memory_space<vmem>>, %arg1: memref<16x32xf32, #tpu.memory_space<vmem>>, %arg2: memref<2x1x8xf32, #tpu.memory_space<vmem>>, %arg3: memref<32x32xf32, #tpu.memory_space<vmem>>, %arg4: memref<32x64xf32, #tpu.memory_space<vmem>>, %arg5: memref<32x32xf32, #tpu.memory_space<vmem>>, %arg6: memref<32x64xf32, #tpu.memory_space<vmem>>, %arg7: memref<64x32xf32, #tpu.memory_space<vmem>>, %arg8: memref<7x32xf32, #tpu.memory_space<vmem>>, %arg9: memref<1x64xf32, #tpu.memory_space<vmem>>, %arg10: memref<1x64xf32, #tpu.memory_space<vmem>>, %arg11: memref<16x32xf32, #tpu.memory_space<vmem>>, %arg12: memref<2x8x8xf32, #tpu.memory_space<vmem>>) attributes {dimension_semantics = [], scalar_prefetch = 0 : i64, scratch_operands = 0 : i64, tpu.core_type = #tpu.core_type<tc>} {
    %c0 = arith.constant 0 : index
    %c0_0 = arith.constant 0 : index
    %0 = vector.load %arg0[%c0, %c0_0] : memref<16x32xf32, #tpu.memory_space<vmem>>, vector<16x32xf32>
    %c0_1 = arith.constant 0 : index
    %c0_2 = arith.constant 0 : index
    %1 = vector.load %arg1[%c0_1, %c0_2] : memref<16x32xf32, #tpu.memory_space<vmem>>, vector<16x32xf32>
    %c0_3 = arith.constant 0 : index
    %c0_4 = arith.constant 0 : index
    %c0_5 = arith.constant 0 : index
    %2 = vector.load %arg2[%c0_3, %c0_4, %c0_5] : memref<2x1x8xf32, #tpu.memory_space<vmem>>, vector<2x1x8xf32>
    %c0_6 = arith.constant 0 : index
    %c0_7 = arith.constant 0 : index
    %3 = vector.load %arg8[%c0_6, %c0_7] : memref<7x32xf32, #tpu.memory_space<vmem>>, vector<7x32xf32>
    %4 = vector.extract_strided_slice %3 {offsets = [0, 0], sizes = [1, 32], strides = [1, 1]} : vector<7x32xf32> to vector<1x32xf32>
    %5 = vector.extract_strided_slice %3 {offsets = [1, 0], sizes = [1, 32], strides = [1, 1]} : vector<7x32xf32> to vector<1x32xf32>
    %6 = vector.extract_strided_slice %3 {offsets = [2, 0], sizes = [1, 32], strides = [1, 1]} : vector<7x32xf32> to vector<1x32xf32>
    %7 = vector.extract_strided_slice %3 {offsets = [3, 0], sizes = [1, 32], strides = [1, 1]} : vector<7x32xf32> to vector<1x32xf32>
    %8 = vector.extract_strided_slice %3 {offsets = [4, 0], sizes = [1, 32], strides = [1, 1]} : vector<7x32xf32> to vector<1x32xf32>
    %9 = vector.extract_strided_slice %3 {offsets = [5, 0], sizes = [1, 32], strides = [1, 1]} : vector<7x32xf32> to vector<1x32xf32>
    %10 = vector.extract_strided_slice %3 {offsets = [6, 0], sizes = [1, 32], strides = [1, 1]} : vector<7x32xf32> to vector<1x32xf32>
    %c0_8 = arith.constant 0 : index
    %c0_9 = arith.constant 0 : index
    %11 = vector.load %arg3[%c0_8, %c0_9] : memref<32x32xf32, #tpu.memory_space<vmem>>, vector<32x32xf32>
    %cst = arith.constant dense<0.000000e+00> : vector<16x32xf32>
    %12 = tpu.matmul %0, %11, %cst {dimension_numbers = #tpu.dot_dimension_numbers<[1], [0], [0], [1], [0, 0, 1, 1], [], []>} : vector<16x32xf32>, vector<32x32xf32>, vector<16x32xf32> -> vector<16x32xf32>
    %13 = vector.broadcast %4 : vector<1x32xf32> to vector<16x32xf32>
    %14 = arith.addf %12, %13 : vector<16x32xf32>
    %cst_10 = arith.constant 0.353553385 : f32
    %15 = vector.broadcast %cst_10 : f32 to vector<16x32xf32>
    %16 = arith.mulf %14, %15 : vector<16x32xf32>
    %c0_11 = arith.constant 0 : index
    %c0_12 = arith.constant 0 : index
    %17 = vector.load %arg4[%c0_11, %c0_12] : memref<32x64xf32, #tpu.memory_space<vmem>>, vector<32x64xf32>
    %cst_13 = arith.constant dense<0.000000e+00> : vector<16x64xf32>
    %18 = tpu.matmul %1, %17, %cst_13 {dimension_numbers = #tpu.dot_dimension_numbers<[1], [0], [0], [1], [0, 0, 1, 1], [], []>} : vector<16x32xf32>, vector<32x64xf32>, vector<16x64xf32> -> vector<16x64xf32>
    %c0_14 = arith.constant 0 : index
    %c0_15 = arith.constant 0 : index
    %19 = vector.load %arg9[%c0_14, %c0_15] : memref<1x64xf32, #tpu.memory_space<vmem>>, vector<1x64xf32>
    %20 = vector.broadcast %19 : vector<1x64xf32> to vector<16x64xf32>
    %21 = arith.addf %18, %20 : vector<16x64xf32>
    %22 = vector.extract_strided_slice %21 {offsets = [0, 0], sizes = [16, 32], strides = [1, 1]} : vector<16x64xf32> to vector<16x32xf32>
    %23 = vector.extract_strided_slice %21 {offsets = [0, 32], sizes = [16, 32], strides = [1, 1]} : vector<16x64xf32> to vector<16x32xf32>
    %24 = vector.shape_cast %16 : vector<16x32xf32> to vector<2x8x32xf32>
    %25 = vector.shape_cast %22 : vector<16x32xf32> to vector<2x8x32xf32>
    %26 = vector.shape_cast %23 : vector<16x32xf32> to vector<2x8x32xf32>
    %c0_16 = arith.constant 0 : index
    %c0_17 = arith.constant 0 : index
    %27 = vector.load %arg5[%c0_16, %c0_17] : memref<32x32xf32, #tpu.memory_space<vmem>>, vector<32x32xf32>
    %28 = vector.shape_cast %2 : vector<2x1x8xf32> to vector<2x1x8xf32>
    %29 = vector.broadcast %28 : vector<2x1x8xf32> to vector<2x8x8xf32>
    %cst_18 = arith.constant 0.000000e+00 : f32
    %30 = vector.broadcast %cst_18 : f32 to vector<2x8x8xf32>
    %cst_19 = arith.constant 0.000000e+00 : f32
    %31 = vector.broadcast %cst_19 : f32 to vector<16x32xf32>
    %32 = vector.extract_strided_slice %24 {offsets = [0, 0, 0], sizes = [2, 8, 8], strides = [1, 1, 1]} : vector<2x8x32xf32> to vector<2x8x8xf32>
    %33 = vector.extract_strided_slice %25 {offsets = [0, 0, 0], sizes = [2, 8, 8], strides = [1, 1, 1]} : vector<2x8x32xf32> to vector<2x8x8xf32>
    %34 = vector.extract_strided_slice %26 {offsets = [0, 0, 0], sizes = [2, 8, 8], strides = [1, 1, 1]} : vector<2x8x32xf32> to vector<2x8x8xf32>
    "tpu.trace_start"() <{level = 10 : i32, message = "nld,nsd->nls"}> : () -> ()
    %cst_20 = arith.constant dense<0.000000e+00> : vector<2x8x8xf32>
    %35 = tpu.matmul %32, %33, %cst_20 {dimension_numbers = #tpu.dot_dimension_numbers<[2], [2], [1], [1], [0, 0, 0, 1, 1, 1], [0], [0]>} : vector<2x8x8xf32>, vector<2x8x8xf32>, vector<2x8x8xf32> -> vector<2x8x8xf32>
    "tpu.trace_stop"() : () -> ()
    %36 = arith.addf %35, %29 : vector<2x8x8xf32>
    %cst_21 = arith.constant dense<0xFF800000> : vector<2x8xf32>
    %37 = vector.multi_reduction <maximumf>, %36, %cst_21 [2] : vector<2x8x8xf32> to vector<2x8xf32>
    %38 = vector.shape_cast %37 : vector<2x8xf32> to vector<2x8x1xf32>
    %39 = vector.broadcast %38 : vector<2x8x1xf32> to vector<2x8x8xf32>
    %40 = arith.subf %36, %39 : vector<2x8x8xf32>
    %41 = math.exp %40 : vector<2x8x8xf32>
    %cst_22 = arith.constant dense<0.000000e+00> : vector<2x8xf32>
    %42 = vector.multi_reduction <add>, %41, %cst_22 [2] : vector<2x8x8xf32> to vector<2x8xf32>
    %43 = vector.shape_cast %42 : vector<2x8xf32> to vector<2x8x1xf32>
    %44 = tpu.reciprocal %43 {approx = true} : vector<2x8x1xf32> -> vector<2x8x1xf32>
    %45 = vector.broadcast %44 : vector<2x8x1xf32> to vector<2x8x8xf32>
    %46 = arith.mulf %41, %45 : vector<2x8x8xf32>
    %47 = arith.addf %30, %46 : vector<2x8x8xf32>
    "tpu.trace_start"() <{level = 10 : i32, message = "nls,nsd->nld"}> : () -> ()
    %cst_23 = arith.constant dense<0.000000e+00> : vector<2x8x8xf32>
    %48 = tpu.matmul %46, %34, %cst_23 {dimension_numbers = #tpu.dot_dimension_numbers<[2], [1], [1], [2], [0, 0, 0, 1, 1, 2], [0], [0]>} : vector<2x8x8xf32>, vector<2x8x8xf32>, vector<2x8x8xf32> -> vector<2x8x8xf32>
    "tpu.trace_stop"() : () -> ()
    %49 = vector.shape_cast %48 : vector<2x8x8xf32> to vector<16x8xf32>
    %50 = vector.extract_strided_slice %27 {offsets = [0, 0], sizes = [8, 32], strides = [1, 1]} : vector<32x32xf32> to vector<8x32xf32>
    %cst_24 = arith.constant dense<0.000000e+00> : vector<16x32xf32>
    %51 = tpu.matmul %49, %50, %cst_24 {dimension_numbers = #tpu.dot_dimension_numbers<[1], [0], [0], [1], [0, 0, 1, 1], [], []>} : vector<16x8xf32>, vector<8x32xf32>, vector<16x32xf32> -> vector<16x32xf32>
    %52 = arith.addf %31, %51 : vector<16x32xf32>
    %53 = vector.extract_strided_slice %24 {offsets = [0, 0, 8], sizes = [2, 8, 8], strides = [1, 1, 1]} : vector<2x8x32xf32> to vector<2x8x8xf32>
    %54 = vector.extract_strided_slice %25 {offsets = [0, 0, 8], sizes = [2, 8, 8], strides = [1, 1, 1]} : vector<2x8x32xf32> to vector<2x8x8xf32>
    %55 = vector.extract_strided_slice %26 {offsets = [0, 0, 8], sizes = [2, 8, 8], strides = [1, 1, 1]} : vector<2x8x32xf32> to vector<2x8x8xf32>
    "tpu.trace_start"() <{level = 10 : i32, message = "nld,nsd->nls"}> : () -> ()
    %cst_25 = arith.constant dense<0.000000e+00> : vector<2x8x8xf32>
    %56 = tpu.matmul %53, %54, %cst_25 {dimension_numbers = #tpu.dot_dimension_numbers<[2], [2], [1], [1], [0, 0, 0, 1, 1, 1], [0], [0]>} : vector<2x8x8xf32>, vector<2x8x8xf32>, vector<2x8x8xf32> -> vector<2x8x8xf32>
    "tpu.trace_stop"() : () -> ()
    %57 = arith.addf %56, %29 : vector<2x8x8xf32>
    %cst_26 = arith.constant dense<0xFF800000> : vector<2x8xf32>
    %58 = vector.multi_reduction <maximumf>, %57, %cst_26 [2] : vector<2x8x8xf32> to vector<2x8xf32>
    %59 = vector.shape_cast %58 : vector<2x8xf32> to vector<2x8x1xf32>
    %60 = vector.broadcast %59 : vector<2x8x1xf32> to vector<2x8x8xf32>
    %61 = arith.subf %57, %60 : vector<2x8x8xf32>
    %62 = math.exp %61 : vector<2x8x8xf32>
    %cst_27 = arith.constant dense<0.000000e+00> : vector<2x8xf32>
    %63 = vector.multi_reduction <add>, %62, %cst_27 [2] : vector<2x8x8xf32> to vector<2x8xf32>
    %64 = vector.shape_cast %63 : vector<2x8xf32> to vector<2x8x1xf32>
    %65 = tpu.reciprocal %64 {approx = true} : vector<2x8x1xf32> -> vector<2x8x1xf32>
    %66 = vector.broadcast %65 : vector<2x8x1xf32> to vector<2x8x8xf32>
    %67 = arith.mulf %62, %66 : vector<2x8x8xf32>
    %68 = arith.addf %47, %67 : vector<2x8x8xf32>
    "tpu.trace_start"() <{level = 10 : i32, message = "nls,nsd->nld"}> : () -> ()
    %cst_28 = arith.constant dense<0.000000e+00> : vector<2x8x8xf32>
    %69 = tpu.matmul %67, %55, %cst_28 {dimension_numbers = #tpu.dot_dimension_numbers<[2], [1], [1], [2], [0, 0, 0, 1, 1, 2], [0], [0]>} : vector<2x8x8xf32>, vector<2x8x8xf32>, vector<2x8x8xf32> -> vector<2x8x8xf32>
    "tpu.trace_stop"() : () -> ()
    %70 = vector.shape_cast %69 : vector<2x8x8xf32> to vector<16x8xf32>
    %71 = vector.extract_strided_slice %27 {offsets = [8, 0], sizes = [8, 32], strides = [1, 1]} : vector<32x32xf32> to vector<8x32xf32>
    %cst_29 = arith.constant dense<0.000000e+00> : vector<16x32xf32>
    %72 = tpu.matmul %70, %71, %cst_29 {dimension_numbers = #tpu.dot_dimension_numbers<[1], [0], [0], [1], [0, 0, 1, 1], [], []>} : vector<16x8xf32>, vector<8x32xf32>, vector<16x32xf32> -> vector<16x32xf32>
    %73 = arith.addf %52, %72 : vector<16x32xf32>
    %74 = vector.extract_strided_slice %24 {offsets = [0, 0, 16], sizes = [2, 8, 8], strides = [1, 1, 1]} : vector<2x8x32xf32> to vector<2x8x8xf32>
    %75 = vector.extract_strided_slice %25 {offsets = [0, 0, 16], sizes = [2, 8, 8], strides = [1, 1, 1]} : vector<2x8x32xf32> to vector<2x8x8xf32>
    %76 = vector.extract_strided_slice %26 {offsets = [0, 0, 16], sizes = [2, 8, 8], strides = [1, 1, 1]} : vector<2x8x32xf32> to vector<2x8x8xf32>
    "tpu.trace_start"() <{level = 10 : i32, message = "nld,nsd->nls"}> : () -> ()
    %cst_30 = arith.constant dense<0.000000e+00> : vector<2x8x8xf32>
    %77 = tpu.matmul %74, %75, %cst_30 {dimension_numbers = #tpu.dot_dimension_numbers<[2], [2], [1], [1], [0, 0, 0, 1, 1, 1], [0], [0]>} : vector<2x8x8xf32>, vector<2x8x8xf32>, vector<2x8x8xf32> -> vector<2x8x8xf32>
    "tpu.trace_stop"() : () -> ()
    %78 = arith.addf %77, %29 : vector<2x8x8xf32>
    %cst_31 = arith.constant dense<0xFF800000> : vector<2x8xf32>
    %79 = vector.multi_reduction <maximumf>, %78, %cst_31 [2] : vector<2x8x8xf32> to vector<2x8xf32>
    %80 = vector.shape_cast %79 : vector<2x8xf32> to vector<2x8x1xf32>
    %81 = vector.broadcast %80 : vector<2x8x1xf32> to vector<2x8x8xf32>
    %82 = arith.subf %78, %81 : vector<2x8x8xf32>
    %83 = math.exp %82 : vector<2x8x8xf32>
    %cst_32 = arith.constant dense<0.000000e+00> : vector<2x8xf32>
    %84 = vector.multi_reduction <add>, %83, %cst_32 [2] : vector<2x8x8xf32> to vector<2x8xf32>
    %85 = vector.shape_cast %84 : vector<2x8xf32> to vector<2x8x1xf32>
    %86 = tpu.reciprocal %85 {approx = true} : vector<2x8x1xf32> -> vector<2x8x1xf32>
    %87 = vector.broadcast %86 : vector<2x8x1xf32> to vector<2x8x8xf32>
    %88 = arith.mulf %83, %87 : vector<2x8x8xf32>
    %89 = arith.addf %68, %88 : vector<2x8x8xf32>
    "tpu.trace_start"() <{level = 10 : i32, message = "nls,nsd->nld"}> : () -> ()
    %cst_33 = arith.constant dense<0.000000e+00> : vector<2x8x8xf32>
    %90 = tpu.matmul %88, %76, %cst_33 {dimension_numbers = #tpu.dot_dimension_numbers<[2], [1], [1], [2], [0, 0, 0, 1, 1, 2], [0], [0]>} : vector<2x8x8xf32>, vector<2x8x8xf32>, vector<2x8x8xf32> -> vector<2x8x8xf32>
    "tpu.trace_stop"() : () -> ()
    %91 = vector.shape_cast %90 : vector<2x8x8xf32> to vector<16x8xf32>
    %92 = vector.extract_strided_slice %27 {offsets = [16, 0], sizes = [8, 32], strides = [1, 1]} : vector<32x32xf32> to vector<8x32xf32>
    %cst_34 = arith.constant dense<0.000000e+00> : vector<16x32xf32>
    %93 = tpu.matmul %91, %92, %cst_34 {dimension_numbers = #tpu.dot_dimension_numbers<[1], [0], [0], [1], [0, 0, 1, 1], [], []>} : vector<16x8xf32>, vector<8x32xf32>, vector<16x32xf32> -> vector<16x32xf32>
    %94 = arith.addf %73, %93 : vector<16x32xf32>
    %95 = vector.extract_strided_slice %24 {offsets = [0, 0, 24], sizes = [2, 8, 8], strides = [1, 1, 1]} : vector<2x8x32xf32> to vector<2x8x8xf32>
    %96 = vector.extract_strided_slice %25 {offsets = [0, 0, 24], sizes = [2, 8, 8], strides = [1, 1, 1]} : vector<2x8x32xf32> to vector<2x8x8xf32>
    %97 = vector.extract_strided_slice %26 {offsets = [0, 0, 24], sizes = [2, 8, 8], strides = [1, 1, 1]} : vector<2x8x32xf32> to vector<2x8x8xf32>
    "tpu.trace_start"() <{level = 10 : i32, message = "nld,nsd->nls"}> : () -> ()
    %cst_35 = arith.constant dense<0.000000e+00> : vector<2x8x8xf32>
    %98 = tpu.matmul %95, %96, %cst_35 {dimension_numbers = #tpu.dot_dimension_numbers<[2], [2], [1], [1], [0, 0, 0, 1, 1, 1], [0], [0]>} : vector<2x8x8xf32>, vector<2x8x8xf32>, vector<2x8x8xf32> -> vector<2x8x8xf32>
    "tpu.trace_stop"() : () -> ()
    %99 = arith.addf %98, %29 : vector<2x8x8xf32>
    %cst_36 = arith.constant dense<0xFF800000> : vector<2x8xf32>
    %100 = vector.multi_reduction <maximumf>, %99, %cst_36 [2] : vector<2x8x8xf32> to vector<2x8xf32>
    %101 = vector.shape_cast %100 : vector<2x8xf32> to vector<2x8x1xf32>
    %102 = vector.broadcast %101 : vector<2x8x1xf32> to vector<2x8x8xf32>
    %103 = arith.subf %99, %102 : vector<2x8x8xf32>
    %104 = math.exp %103 : vector<2x8x8xf32>
    %cst_37 = arith.constant dense<0.000000e+00> : vector<2x8xf32>
    %105 = vector.multi_reduction <add>, %104, %cst_37 [2] : vector<2x8x8xf32> to vector<2x8xf32>
    %106 = vector.shape_cast %105 : vector<2x8xf32> to vector<2x8x1xf32>
    %107 = tpu.reciprocal %106 {approx = true} : vector<2x8x1xf32> -> vector<2x8x1xf32>
    %108 = vector.broadcast %107 : vector<2x8x1xf32> to vector<2x8x8xf32>
    %109 = arith.mulf %104, %108 : vector<2x8x8xf32>
    %110 = arith.addf %89, %109 : vector<2x8x8xf32>
    "tpu.trace_start"() <{level = 10 : i32, message = "nls,nsd->nld"}> : () -> ()
    %cst_38 = arith.constant dense<0.000000e+00> : vector<2x8x8xf32>
    %111 = tpu.matmul %109, %97, %cst_38 {dimension_numbers = #tpu.dot_dimension_numbers<[2], [1], [1], [2], [0, 0, 0, 1, 1, 2], [0], [0]>} : vector<2x8x8xf32>, vector<2x8x8xf32>, vector<2x8x8xf32> -> vector<2x8x8xf32>
    "tpu.trace_stop"() : () -> ()
    %112 = vector.shape_cast %111 : vector<2x8x8xf32> to vector<16x8xf32>
    %113 = vector.extract_strided_slice %27 {offsets = [24, 0], sizes = [8, 32], strides = [1, 1]} : vector<32x32xf32> to vector<8x32xf32>
    %cst_39 = arith.constant dense<0.000000e+00> : vector<16x32xf32>
    %114 = tpu.matmul %112, %113, %cst_39 {dimension_numbers = #tpu.dot_dimension_numbers<[1], [0], [0], [1], [0, 0, 1, 1], [], []>} : vector<16x8xf32>, vector<8x32xf32>, vector<16x32xf32> -> vector<16x32xf32>
    %115 = arith.addf %94, %114 : vector<16x32xf32>
    %cst_40 = arith.constant 2.500000e-01 : f32
    %116 = vector.broadcast %cst_40 : f32 to vector<2x8x8xf32>
    %117 = arith.mulf %110, %116 : vector<2x8x8xf32>
    %c0_41 = arith.constant 0 : index
    %c0_42 = arith.constant 0 : index
    %c0_43 = arith.constant 0 : index
    %118 = vector.load %arg12[%c0_41, %c0_42, %c0_43] : memref<2x8x8xf32, #tpu.memory_space<vmem>>, vector<2x8x8xf32>
    tpu.vector_store %arg12[%c0_41, %c0_42, %c0_43], %117 {strides = array<i32>} : memref<2x8x8xf32, #tpu.memory_space<vmem>>, vector<2x8x8xf32>,
    %119 = vector.broadcast %5 : vector<1x32xf32> to vector<16x32xf32>
    %120 = arith.addf %115, %119 : vector<16x32xf32>
    %121 = arith.addf %0, %120 : vector<16x32xf32>
    %cst_44 = arith.constant dense<0.000000e+00> : vector<16xf32>
    %122 = vector.multi_reduction <add>, %121, %cst_44 [1] : vector<16x32xf32> to vector<16xf32>
    %123 = vector.shape_cast %122 : vector<16xf32> to vector<16x1xf32>
    %cst_45 = arith.constant 3.200000e+01 : f32
    %124 = vector.broadcast %cst_45 : f32 to vector<16x1xf32>
    %125 = arith.divf %123, %124 : vector<16x1xf32>
    %126 = vector.broadcast %125 : vector<16x1xf32> to vector<16x32xf32>
    %127 = arith.subf %121, %126 : vector<16x32xf32>
    %128 = arith.mulf %127, %127 : vector<16x32xf32>
    %cst_46 = arith.constant dense<0.000000e+00> : vector<16xf32>
    %129 = vector.multi_reduction <add>, %128, %cst_46 [1] : vector<16x32xf32> to vector<16xf32>
    %130 = vector.shape_cast %129 : vector<16xf32> to vector<16x1xf32>
    %cst_47 = arith.constant 3.200000e+01 : f32
    %131 = vector.broadcast %cst_47 : f32 to vector<16x1xf32>
    %132 = arith.divf %130, %131 : vector<16x1xf32>
    %133 = vector.broadcast %125 : vector<16x1xf32> to vector<16x32xf32>
    %134 = arith.subf %121, %133 : vector<16x32xf32>
    %cst_48 = arith.constant 9.99999974E-6 : f32
    %135 = vector.broadcast %cst_48 : f32 to vector<16x1xf32>
    %136 = arith.addf %132, %135 : vector<16x1xf32>
    %137 = math.rsqrt %136 : vector<16x1xf32>
    %138 = vector.broadcast %137 : vector<16x1xf32> to vector<16x32xf32>
    %139 = arith.mulf %134, %138 : vector<16x32xf32>
    %140 = vector.broadcast %7 : vector<1x32xf32> to vector<16x32xf32>
    %141 = arith.mulf %139, %140 : vector<16x32xf32>
    %142 = vector.broadcast %8 : vector<1x32xf32> to vector<16x32xf32>
    %143 = arith.addf %141, %142 : vector<16x32xf32>
    %c0_49 = arith.constant 0 : index
    %c0_50 = arith.constant 0 : index
    %144 = vector.load %arg6[%c0_49, %c0_50] : memref<32x64xf32, #tpu.memory_space<vmem>>, vector<32x64xf32>
    %cst_51 = arith.constant dense<0.000000e+00> : vector<16x64xf32>
    %145 = tpu.matmul %143, %144, %cst_51 {dimension_numbers = #tpu.dot_dimension_numbers<[1], [0], [0], [1], [0, 0, 1, 1], [], []>} : vector<16x32xf32>, vector<32x64xf32>, vector<16x64xf32> -> vector<16x64xf32>
    %c0_52 = arith.constant 0 : index
    %c0_53 = arith.constant 0 : index
    %146 = vector.load %arg10[%c0_52, %c0_53] : memref<1x64xf32, #tpu.memory_space<vmem>>, vector<1x64xf32>
    %147 = vector.broadcast %146 : vector<1x64xf32> to vector<16x64xf32>
    %148 = arith.addf %145, %147 : vector<16x64xf32>
    %cst_54 = arith.constant 0.000000e+00 : f32
    %149 = vector.broadcast %cst_54 : f32 to vector<16x64xf32>
    %150 = arith.maximumf %148, %149 : vector<16x64xf32>
    %c0_55 = arith.constant 0 : index
    %c0_56 = arith.constant 0 : index
    %151 = vector.load %arg7[%c0_55, %c0_56] : memref<64x32xf32, #tpu.memory_space<vmem>>, vector<64x32xf32>
    %cst_57 = arith.constant dense<0.000000e+00> : vector<16x32xf32>
    %152 = tpu.matmul %150, %151, %cst_57 {dimension_numbers = #tpu.dot_dimension_numbers<[1], [0], [0], [1], [0, 0, 1, 1], [], []>} : vector<16x64xf32>, vector<64x32xf32>, vector<16x32xf32> -> vector<16x32xf32>
    %153 = vector.broadcast %6 : vector<1x32xf32> to vector<16x32xf32>
    %154 = arith.addf %152, %153 : vector<16x32xf32>
    %155 = arith.addf %143, %154 : vector<16x32xf32>
    %cst_58 = arith.constant dense<0.000000e+00> : vector<16xf32>
    %156 = vector.multi_reduction <add>, %155, %cst_58 [1] : vector<16x32xf32> to vector<16xf32>
    %157 = vector.shape_cast %156 : vector<16xf32> to vector<16x1xf32>
    %cst_59 = arith.constant 3.200000e+01 : f32
    %158 = vector.broadcast %cst_59 : f32 to vector<16x1xf32>
    %159 = arith.divf %157, %158 : vector<16x1xf32>
    %160 = vector.broadcast %159 : vector<16x1xf32> to vector<16x32xf32>
    %161 = arith.subf %155, %160 : vector<16x32xf32>
    %162 = arith.mulf %161, %161 : vector<16x32xf32>
    %cst_60 = arith.constant dense<0.000000e+00> : vector<16xf32>
    %163 = vector.multi_reduction <add>, %162, %cst_60 [1] : vector<16x32xf32> to vector<16xf32>
    %164 = vector.shape_cast %163 : vector<16xf32> to vector<16x1xf32>
    %cst_61 = arith.constant 3.200000e+01 : f32
    %165 = vector.broadcast %cst_61 : f32 to vector<16x1xf32>
    %166 = arith.divf %164, %165 : vector<16x1xf32>
    %167 = vector.broadcast %159 : vector<16x1xf32> to vector<16x32xf32>
    %168 = arith.subf %155, %167 : vector<16x32xf32>
    %cst_62 = arith.constant 9.99999974E-6 : f32
    %169 = vector.broadcast %cst_62 : f32 to vector<16x1xf32>
    %170 = arith.addf %166, %169 : vector<16x1xf32>
    %171 = math.rsqrt %170 : vector<16x1xf32>
    %172 = vector.broadcast %171 : vector<16x1xf32> to vector<16x32xf32>
    %173 = arith.mulf %168, %172 : vector<16x32xf32>
    %174 = vector.broadcast %9 : vector<1x32xf32> to vector<16x32xf32>
    %175 = arith.mulf %173, %174 : vector<16x32xf32>
    %176 = vector.broadcast %10 : vector<1x32xf32> to vector<16x32xf32>
    %177 = arith.addf %175, %176 : vector<16x32xf32>
    %c0_63 = arith.constant 0 : index
    %c0_64 = arith.constant 0 : index
    %178 = vector.load %arg11[%c0_63, %c0_64] : memref<16x32xf32, #tpu.memory_space<vmem>>, vector<16x32xf32>
    tpu.vector_store %arg11[%c0_63, %c0_64], %177 {strides = array<i32>} : memref<16x32xf32, #tpu.memory_space<vmem>>, vector<16x32xf32>,
    return
  }
}

</mosaic_0001>

<bundles_post_ra>
// kernel: tpu_custom_call.1
= control target key start
LH: loop header
LB: loop body
LE: loop exit
PB: predicated region body
PF: predicated region fallthrough
CT: control target
= control target key end

     0   :  { %18 = vsyncpa [#allocation3], 0  ;;  %s3143_s0 = inlined_call_operand.hbm [shape: f32[16,32], index: 0, kind: input, shape index: {}]   ;;  %s3144_s1 = inlined_call_operand.hbm [shape: f32[16,32], index: 1, kind: input, shape index: {}]   ;;  %s3145_s2 = inlined_call_operand.hbm [shape: f32[2,1,8], index: 2, kind: input, shape index: {}]   ;;  %s3146_s3 = inlined_call_operand.vmem [shape: f32[32,32], index: 3, kind: input, shape index: {}]   ;;  %s3147_s4 = inlined_call_operand.vmem [shape: f32[32,64], index: 4, kind: input, shape index: {}]   ;;  %s3148_s5 = inlined_call_operand.vmem [shape: f32[32,32], index: 5, kind: input, shape index: {}]   ;;  %s3149_s6 = inlined_call_operand.hbm [shape: f32[32,64], index: 6, kind: input, shape index: {}]   ;;  %s3150_s7 = inlined_call_operand.vmem [shape: f32[64,32], index: 7, kind: input, shape index: {}]   ;;  %s3151_s8 = inlined_call_operand.vmem [shape: f32[7,32], index: 8, kind: input, shape index: {}]   ;;  %s3152_s9 = inlined_call_operand.vmem [shape: f32[1,64], index: 9, kind: input, shape index: {}]   ;;  %s3153_s10 = inlined_call_operand.vmem [shape: f32[1,64], index: 10, kind: input, shape index: {}]   ;;  %s3154_s11 = inlined_call_operand.hbm [shape: f32[16,32], index: 11, kind: output, shape index: {0}]   ;;  %s3155_s12 = inlined_call_operand.hbm [shape: f32[2,8,8], index: 12, kind: output, shape index: {1}]  }
   0x1   :  { %19 = vsyncpa [#allocation6], 0 }
   0x2   :  { %20 = vsyncpa [#allocation9], 0 }
   0x3   :  { %21 = vsyncpa [#allocation4], 0 }
   0x4   :  { %22 = vsyncpa [#allocation12], 0  ;;  %s2730_s21 = smov [#allocation5]   ;;  %s2731_s23 = smov [#allocation2]  }
   0x5   :  { %s40_s22 = sshll.u32 %s2730_s21, 4  ;;  %s28_s24 = sshll.u32 %s2731_s23, 4  ;;  %s41_s22 = int_to_ptr.vmem [resolvable:$true] %s40_s22  ;;  %s29_s24 = int_to_ptr.vmem [resolvable:$true] %s28_s24 }
   0x6   :  { %s2608_s25 = scalar_lea.vmem %s41_s22, 256  ;;  %p2613_p1 = scmp.lt.s32.totalorder %s41_s22, %s41_s22 }
   0x7   :  { %p2609_p0 = scmp.ne.s32.totalorder %s41_s22, %s2608_s25  ;;  %p2614_p2 = scmp.lt.s32.totalorder %s2608_s25, %s2608_s25 }
   0x9   :  { %p2615_p3 = por %p2614_p2, %p2613_p1 }
   0xb   :  { %p2616_p4 = pnand %p2615_p3, %p2609_p0 }
   0xd   :  { %2619 = shalt.err (!%p2616_p4)
}
   0xe   :  { %s2732_s26 = smov 128   ;;  %s2733_s27 = smov 8  }
   0xf   :  { %46 = dma.hbm_to_vmem [thread:$0]  %s3144_s1, 256, %s41_s22, [#allocation6], %s2732_s26, %s2732_s26, %s2733_s27  }
  0x10   :  { %s2628_s30 = scalar_lea.vmem %s29_s24, 256  ;;  %p2633_p6 = scmp.lt.s32.totalorder %s29_s24, %s29_s24 }
  0x11   :  { %p2629_p5 = scmp.ne.s32.totalorder %s29_s24, %s2628_s30  ;;  %p2634_p7 = scmp.lt.s32.totalorder %s2628_s30, %s2628_s30 }
  0x13   :  { %p2635_p8 = por %p2634_p7, %p2633_p6 }
  0x15   :  { %p2636_p9 = pnand %p2635_p8, %p2629_p5 }
  0x17   :  { %2639 = shalt.err (!%p2636_p9)
}
  0x18   :  { %34 = dma.hbm_to_vmem [thread:$0]  %s3143_s0, 256, %s29_s24, [#allocation3], %s2732_s26, %s2732_s26, %s2733_s27  }
  0x19   :  { %s2734_s15 = smov [#allocation7]  }
  0x1a   :  { %s52_s16 = sshll.u32 %s2734_s15, 4  ;;  %s53_s16 = int_to_ptr.vmem [resolvable:$true] %s52_s16 }
  0x1b   :  { %s2648_s17 = scalar_lea.vmem %s53_s16, 32  ;;  %p2653_p11 = scmp.lt.s32.totalorder %s53_s16, %s53_s16 }
  0x1c   :  { %p2649_p10 = scmp.ne.s32.totalorder %s53_s16, %s2648_s17  ;;  %p2654_p12 = scmp.lt.s32.totalorder %s2648_s17, %s2648_s17 }
  0x1e   :  { %p2655_p13 = por %p2654_p12, %p2653_p11 }
  0x20   :  { %p2656_p0 = pnand %p2655_p13, %p2649_p10 }
  0x22   :  { %2659 = shalt.err (!%p2656_p0)
}
  0x23   :  { %s2735_s1 = smov 16   ;;  %s2736_s18 = smov 1  }
  0x24   :  { %58 = dma.hbm_to_vmem [thread:$0]  %s3145_s2, 32, %s53_s16, [#allocation6], %s2735_s1, %s2735_s1, %s2736_s18  }
  0x25   :  { %s2737_s21 = smov [#allocation8]  }
  0x26   :  { %s70_s22 = sshll.u32 %s2737_s21, 4  ;;  %s71_s22 = int_to_ptr.vmem [resolvable:$true] %s70_s22 }
  0x27   :  { %s2668_s0 = scalar_lea.vmem %s71_s22, 512  ;;  %p2673_p2 = scmp.lt.s32.totalorder %s71_s22, %s71_s22 }
  0x28   :  { %p2669_p1 = scmp.ne.s32.totalorder %s71_s22, %s2668_s0  ;;  %p2674_p3 = scmp.lt.s32.totalorder %s2668_s0, %s2668_s0 }
  0x2a   :  { %p2675_p4 = por %p2674_p3, %p2673_p2 }
  0x2c   :  { %p2676_p5 = pnand %p2675_p4, %p2669_p1 }
  0x2e   :  { %2679 = shalt.err (!%p2676_p5)
}
  0x2f   :  { %76 = dma.hbm_to_vmem [thread:$0]  %s3149_s6, 512, %s71_s22, [#allocation9], %s2732_s26, %s2732_s26, %s2733_s27  }
  0x30   :  { %2720 = dma.done.wait [#allocation3], 256  }
  0x31   :  { %2721 = vsyncadd [#allocation3], 4294967040 }
  0x32   :  { %2722 = dma.done.wait [#allocation6], 288  }
  0x33   :  { %2723 = vsyncadd [#allocation6], 4294967008 }
  0x34   :  { %2724 = dma.done.wait [#allocation9], 512  }
  0x35   :  { %2725 = vsyncadd [#allocation9], 4294966784  ;;  %v107_v0 = vld [vmem:[%s3146_s3 + $0x18] sm:$0xff]  ;;  %v106_v2 = vld [vmem:[%s3146_s3 + $0x10] sm:$0xff]  ;;  %vm112_vm0 = vcmask 261120   ;;  %v2738_v12 = vmov 0.0   ;;  %v108_v13 = vlaneseq }
  0x36   :  { %v199_v1 = vld [vmem:[%s3147_s4 + $0x18] sm:$0xff]  ;;  %2389 = vmatprep.subr.mxu0 %v107_v0  ;;  %v198_v3 = vld [vmem:[%s3147_s4 + $0x10] sm:$0xff]  ;;  %v105_v4 = vld [vmem:[%s3146_s3 + $0x8] sm:$0xff]  ;;  %vm2739_vm1 = vmmov 0   ;;  %vm304_vm2 = vcmask 64512   ;;  %s2740_s23 = smov 96  }
  0x37   :  { %2400 = vmatprep.subr.mxu1 %v199_v1  ;;  %2390 = vmatpush3.msra.mxu0 %v107_v0  ;;  %v197_v5 = vld [vmem:[%s3147_s4 + $0x8] sm:$0xff]  ;;  %v104_v6 = vld [vmem:[%s3146_s3] sm:$0xff]  ;;  %v99_v9 = vld [vmem:[#allocation5] sm:$0xff]  ;;  %v2875_v14 = vshrl.u32 %v108_v13, 7  ;;  %s2743_s24 = smov 112   ;;  %s2744_s30 = smov 80  }
  0x38   :  { %2401 = vmatpush3.msra.mxu1 %v199_v1  ;;  %2391 = vmatprep.subr.mxu0 %v106_v2  ;;  %v196_v7 = vld [vmem:[%s3147_s4] sm:$0xff]  ;;  %v2861_v10 = vld [vmem:[#allocation2 + $0x8] sm:$0xff]  ;;  %v100_v11 = vld [vmem:[#allocation5 + $0x8] sm:$0xff]  ;;  %s2745_s13 = smov 104   ;;  %s2746_s15 = smov 72   ;;  %vm2114_vm3 = vcmask 523264  }
  0x39   :  { %2402 = vmatprep.subr.mxu1 %v198_v3  ;;  %2392 = vmatpush3.msra.mxu0 %v106_v2  ;;  %v2859_v8 = vld [vmem:[#allocation2] sm:$0xff]  ;;  %v110_v15 = vsub.s32 0, %v2875_v14 }
  0x3a   :  { %2403 = vmatpush3.msra.mxu1 %v198_v3  ;;  %2393 = vmatprep.subr.mxu0 %v105_v4  ;;  %v2881_v16 = vld [vmem:[%s3151_s8] sm:$0x7f]  ;;  %s2741_s8 = smov 120  }
  0x3b   :  { %2404 = vmatprep.subr.mxu1 %v197_v5  ;;  %2394 = vmatpush3.msra.mxu0 %v105_v4  ;;  %v2275_v17 = vld [vmem:[%s3152_s9] ss:$0 sm:$0xff]  ;;  %v111_v18 = vrot.slane %v2881_v16, %v110_v15  ;;  %v2919_v34 = vld [vmem:[#allocation7 + $0x1] ss:$0 sm:$0xff]  ;;  %s2742_s9 = smov 88  }
  0x3c   :  { %2405 = vmatpush3.msra.mxu1 %v197_v5  ;;  %2395 = vmatprep.subr.mxu0 %v104_v6  ;;  %v2916_v30 = vld [vmem:[#allocation7] ss:$0 sm:$0xff] }
  0x3d   :  { %2406 = vmatprep.subr.mxu1 %v196_v7  ;;  %2396 = vmatpush3.msra.mxu0 %v104_v6 }
  0x3e   :  { %2397 = vmatprep.mubr.msk.f32.mxu0 %vm112_vm0, %v2859_v8  ;;  %2407 = vmatpush3.msra.mxu1 %v196_v7 }
  0x3f   :  { %2408 = vmatprep.mubr.msk.f32.mxu1 %vm112_vm0, %v99_v9  ;;  %2398 = vmatmul.mubr.msk.f32.vlgmr.msra.gmra.mxu0 %vm112_vm0, %v2861_v10 }
  0x40   :  { %2409 = vmatmul.mubr.msk.f32.vlgmr.msra.gmra.mxu1 %vm112_vm0, %v100_v11  ;;  %2411 = vmatprep.subr.mxu0 %v2738_v12 }
  0x41   :  { %2426 = vmatprep.subr.mxu1 %v2738_v12  ;;  %2413 = vmatprep.mubr.msk.f32.mxu0 %vm2739_vm1, %v2738_v12 }
  0x42   :  { %2428 = vmatprep.mubr.msk.f32.mxu1 %vm2739_vm1, %v2738_v12 }
  0xff   :  { %v2399_v19 = vpop.f32.mrf.mxu0 }
 0x100   :  { %v2410_v20 = vpop.f32.mrf.mxu1  ;;  %v191_v27 = vadd.f32 %v2399_v19, %v111_v18 }
 0x101   :  { %v2887_v21 = vadd.f32 %v2410_v20, %v2275_v17  ;;  %v185_v22 = vpop.f32.mrf.mxu0 }
 0x102   :  { %v279_v23 = vpop.f32.mrf.mxu1  ;;  %v186_v24 = vadd.f32 %v185_v22, %v111_v18  ;;  %v2906_v28 = vmul.f32 0.35355338, %v191_v27 }
 0x103   :  { %v2889_v25 = vadd.f32 %v2275_v17, %v279_v23  ;;  %557 = vrot.lane.b32.xlu1 %v2887_v21, %s2740_s23 }
 0x104   :  { %v2893_v26 = vmul.f32 0.35355338, %v186_v24 }
 0x105   :  { %2412 = vmatpush3.xpose.msk.msra.mxu0 %vm304_vm2, %v2889_v25 }
 0x106   :  { %2416 = vmatprep.subr.mxu0 %v2738_v12 }
 0x107   :  { %635 = vrot.lane.b32.xlu1 %v2889_v25, %s2741_s8 }
 0x108   :  { %2414 = vmatmul.mubr.msk.f32.vlgmr.msra.gmra.mxu0 %vm304_vm2, %v2893_v26 }
 0x109   :  { %2417 = vmatpush3.xpose.msk.msra.mxu0 %vm304_vm2, %v2887_v21  ;;  %2418 = vmatprep.mubr.msk.f32.mxu0 %vm2739_vm1, %v2738_v12 }
 0x10a   :  { %2421 = vmatprep.subr.mxu0 %v2738_v12 }
 0x10b   :  { %713 = vrot.lane.b32.xlu1 %v2887_v21, %s2741_s8 }
 0x10c   :  { %2419 = vmatmul.mubr.msk.f32.vlgmr.msra.gmra.mxu0 %vm304_vm2, %v2906_v28 }
 0x10d   :  { %2423 = vmatprep.mubr.msk.f32.mxu0 %vm2739_vm1, %v2738_v12 }
 0x175   :  { %v558_v29 = vpop.permute.xlu1 %557 }
 0x176   :  { %2427 = vmatpush3.msra.mxu1 %v558_v29  ;;  %v288_v29 = vld [vmem:[%s3148_s5] sm:$0xff] }
 0x177   :  { %2436 = vmatprep.subr.mxu1 %v2738_v12 }
 0x179   :  { %v636_v51 = vpop.permute.xlu1 %635 }
 0x17d   :  { %v714_v52 = vpop.permute.xlu1 %713 }
 0x1c8   :  { %v377_v31 = vpop.f32.mrf.mxu0 }
 0x1c9   :  { %v378_v32 = vadd.f32 %v2916_v30, %v377_v31 }
 0x1ca   :  { %v2415_v33 = vpop.f32.mrf.mxu0 }
 0x1cb   :  { %v457_v35 = vsel %vm304_vm2, %v378_v32, -inf }
 0x1cc   :  { %458 = vmax.xlane.f32.xlu0 %v457_v35  ;;  %v453_v36 = vpop.f32.mrf.mxu0 }
 0x1cd   :  { %v454_v37 = vadd.f32 %v2919_v34, %v453_v36 }
 0x1ce   :  { %v2420_v38 = vpop.f32.mrf.mxu0 }
 0x1cf   :  { %v460_v39 = vsel %vm304_vm2, %v454_v37, -inf }
 0x1d0   :  { %461 = vmax.xlane.f32.xlu0 %v460_v39 }
 0x1e6   :  { %481 = vrot.lane.b32.xlu0 %v2889_v25, %s2740_s23 }
 0x1ea   :  { %633 = vrot.lane.b32.xlu0 %v2893_v26, %s2741_s8 }
 0x255   :  { %v459_v40 = vpop.xlane.xlu0 %458 }
 0x256   :  { %v463_v41 = vsub.f32 %v378_v32, %v459_v40 }
 0x258   :  { %v465_v42 = vmul.f32 1.442695, %v463_v41 }
 0x259   :  { %v462_v43 = vpop.xlane.xlu0 %461 }
 0x25a   :  { %2560 = vpow2.f32 %v465_v42  ;;  %v464_v44 = vsub.f32 %v454_v37, %v462_v43  ;;  %v289_v42 = vld [vmem:[%s3148_s5 + $0x8] sm:$0xff] }
 0x25c   :  { %v467_v45 = vmul.f32 1.442695, %v464_v44 }
 0x25d   :  { %v482_v46 = vpop.permute.xlu0 %481 }
 0x25e   :  { %2562 = vpow2.f32 %v467_v45  ;;  %2422 = vmatpush3.msra.mxu0 %v482_v46 }
 0x25f   :  { %2431 = vmatprep.subr.mxu0 %v2738_v12 }
 0x261   :  { %v634_v59 = vpop.permute.xlu0 %633 }
 0x267   :  { %v2561_v47 = vpop.eup %2560 }
 0x268   :  { %v469_v48 = vsel %vm304_vm2, %v2561_v47, 0.0 }
 0x269   :  { %470 = vadd.xlane.f32.xlu1 %v469_v48 }
 0x26b   :  { %v2563_v49 = vpop.eup %2562 }
 0x26c   :  { %v472_v50 = vsel %vm304_vm2, %v2563_v49, 0.0 }
 0x26d   :  { %473 = vadd.xlane.f32.xlu1 %v472_v50 }
 0x27e   :  { %711 = vrot.lane.b32.xlu1 %v2906_v28, %s2741_s8 }
 0x2f2   :  { %v471_v53 = vpop.xlane.xlu1 %470 }
 0x2f3   :  { %2564 = vrcp.f32 %v471_v53 }
 0x2f6   :  { %v474_v54 = vpop.xlane.xlu1 %473 }
 0x2f7   :  { %2566 = vrcp.f32 %v474_v54 }
 0x2fa   :  { %v712_v60 = vpop.permute.xlu1 %711 }
 0x300   :  { %v2565_v55 = vpop.eup %2564 }
 0x301   :  { %v2933_v56 = vmul.f32 %v2565_v55, %v2561_v47 }
 0x303   :  { %2424 = vmatmul.mubr.msk.f32.vlgmr.msra.gmra.mxu0 %vm304_vm2, %v2933_v56 }
 0x304   :  { %v2567_v57 = vpop.eup %2566  ;;  %2432 = vmatpush3.xpose.msk.msra.mxu0 %vm304_vm2, %v636_v51  ;;  %2433 = vmatprep.mubr.msk.f32.mxu0 %vm2739_vm1, %v2738_v12 }
 0x305   :  { %v2940_v58 = vmul.f32 %v2567_v57, %v2563_v49  ;;  %2441 = vmatprep.subr.mxu0 %v2738_v12 }
 0x307   :  { %2429 = vmatmul.mubr.msk.f32.vlgmr.msra.gmra.mxu1 %vm304_vm2, %v2940_v58  ;;  %2434 = vmatmul.mubr.msk.f32.vlgmr.msra.gmra.mxu0 %vm304_vm2, %v634_v59 }
 0x308   :  { %2437 = vmatpush3.xpose.msk.msra.mxu1 %vm304_vm2, %v714_v52  ;;  %2438 = vmatprep.mubr.msk.f32.mxu1 %vm2739_vm1, %v2738_v12 }
 0x309   :  { %2446 = vmatprep.subr.mxu1 %v2738_v12  ;;  %2443 = vmatprep.mubr.msk.f32.mxu0 %vm2739_vm1, %v2738_v12 }
 0x30b   :  { %2439 = vmatmul.mubr.msk.f32.vlgmr.msra.gmra.mxu1 %vm304_vm2, %v712_v60 }
 0x30c   :  { %2448 = vmatprep.mubr.msk.f32.mxu1 %vm2739_vm1, %v2738_v12 }
 0x3c3   :  { %v553_v61 = vpop.f32.mrf.mxu0 }
 0x3c5   :  { %v2425_v62 = vpop.f32.mrf.mxu0 }
 0x3c7   :  { %v629_v63 = vpop.f32.mrf.mxu1  ;;  %v707_v0 = vpop.f32.mrf.mxu0 }
 0x3c8   :  { %v708_v1 = vadd.f32 %v2916_v30, %v707_v0 }
 0x3c9   :  { %v2430_v2 = vpop.f32.mrf.mxu1  ;;  %v2435_v3 = vpop.f32.mrf.mxu0 }
 0x3ca   :  { %v789_v4 = vsel %vm304_vm2, %v708_v1, -inf }
 0x3cb   :  { %v785_v5 = vpop.f32.mrf.mxu1  ;;  %790 = vmax.xlane.f32.xlu0 %v789_v4 }
 0x3cc   :  { %v786_v6 = vadd.f32 %v2919_v34, %v785_v5 }
 0x3cd   :  { %v2440_v7 = vpop.f32.mrf.mxu1 }
 0x3ce   :  { %v792_v9 = vsel %vm304_vm2, %v786_v6, -inf }
 0x3cf   :  { %793 = vmax.xlane.f32.xlu1 %v792_v9 }
 0x3e0   :  { %889 = vrot.lane.b32.xlu1 %v2887_v21, %s2742_s9 }
 0x3e4   :  { %1129 = vrot.lane.b32.xlu1 %v2889_v25, %s2743_s24 }
 0x3e8   :  { %1207 = vrot.lane.b32.xlu1 %v2887_v21, %s2743_s24 }
 0x3ec   :  { %1205 = vrot.lane.b32.xlu1 %v2906_v28, %s2743_s24 }
 0x454   :  { %v791_v11 = vpop.xlane.xlu0 %790 }
 0x455   :  { %v795_v13 = vsub.f32 %v708_v1, %v791_v11 }
 0x457   :  { %v797_v15 = vmul.f32 1.442695, %v795_v13 }
 0x458   :  { %v794_v17 = vpop.xlane.xlu1 %793 }
 0x459   :  { %2568 = vpow2.f32 %v797_v15  ;;  %v796_v18 = vsub.f32 %v786_v6, %v794_v17 }
 0x45b   :  { %v799_v19 = vmul.f32 1.442695, %v796_v18 }
 0x45c   :  { %v890_v20 = vpop.permute.xlu1 %889 }
 0x45d   :  { %2570 = vpow2.f32 %v799_v19  ;;  %2447 = vmatpush3.msra.mxu1 %v890_v20 }
 0x45e   :  { %2456 = vmatprep.subr.mxu1 %v288_v29 }
 0x460   :  { %v1130_v37 = vpop.permute.xlu1 %1129 }
 0x464   :  { %v1208_v40 = vpop.permute.xlu1 %1207 }
 0x466   :  { %v2569_v22 = vpop.eup %2568 }
 0x467   :  { %v801_v23 = vsel %vm304_vm2, %v2569_v22, 0.0 }
 0x468   :  { %802 = vadd.xlane.f32.xlu0 %v801_v23  ;;  %v1206_v41 = vpop.permute.xlu1 %1205 }
 0x46a   :  { %v2571_v24 = vpop.eup %2570 }
 0x46b   :  { %v804_v27 = vsel %vm304_vm2, %v2571_v24, 0.0 }
 0x46c   :  { %805 = vadd.xlane.f32.xlu0 %v804_v27 }
 0x482   :  { %813 = vrot.lane.b32.xlu0 %v2889_v25, %s2742_s9 }
 0x486   :  { %1127 = vrot.lane.b32.xlu0 %v2893_v26, %s2743_s24 }
 0x4f1   :  { %v803_v31 = vpop.xlane.xlu0 %802 }
 0x4f2   :  { %2572 = vrcp.f32 %v803_v31  ;;  %v290_v31 = vld [vmem:[%s3148_s5 + $0x10] sm:$0xff] }
 0x4f5   :  { %v806_v32 = vpop.xlane.xlu0 %805 }
 0x4f6   :  { %2574 = vrcp.f32 %v806_v32 }
 0x4f9   :  { %v814_v33 = vpop.permute.xlu0 %813 }
 0x4fa   :  { %2442 = vmatpush3.msra.mxu0 %v814_v33 }
 0x4fb   :  { %2451 = vmatprep.subr.mxu0 %v289_v42 }
 0x4fd   :  { %v1128_v47 = vpop.permute.xlu0 %1127 }
 0x4ff   :  { %v2573_v35 = vpop.eup %2572 }
 0x500   :  { %v2970_v36 = vmul.f32 %v2573_v35, %v2569_v22 }
 0x502   :  { %2444 = vmatmul.mubr.msk.f32.vlgmr.msra.gmra.mxu0 %vm304_vm2, %v2970_v36 }
 0x503   :  { %v2575_v38 = vpop.eup %2574  ;;  %2452 = vmatpush3.msra.mxu0 %v289_v42 }
 0x504   :  { %v2974_v39 = vmul.f32 %v2575_v38, %v2571_v24  ;;  %2461 = vmatprep.subr.mxu0 %v2738_v12  ;;  %v811_v24 = vadd.f32 %v2970_v36, %v2933_v56 }
 0x506   :  { %2449 = vmatmul.mubr.msk.f32.vlgmr.msra.gmra.mxu1 %vm304_vm2, %v2974_v39  ;;  %v812_v15 = vadd.f32 %v2974_v39, %v2940_v58 }
 0x507   :  { %2458 = vmatprep.mubr.msk.f32.mxu1 %vm304_vm2, %v553_v61  ;;  %2457 = vmatpush3.msra.mxu1 %v288_v29 }
 0x508   :  { %2466 = vmatprep.subr.mxu1 %v2738_v12 }
 0x50a   :  { %2459 = vmatmul.mubr.msk.f32.vlgmr.msra.gmra.mxu1 %vm304_vm2, %v629_v63 }
 0x50b   :  { %2467 = vmatpush3.xpose.msk.msra.mxu1 %vm304_vm2, %v1208_v40  ;;  %2468 = vmatprep.mubr.msk.f32.mxu1 %vm2739_vm1, %v2738_v12 }
 0x50c   :  { %2476 = vmatprep.subr.mxu1 %v2738_v12 }
 0x50e   :  { %2469 = vmatmul.mubr.msk.f32.vlgmr.msra.gmra.mxu1 %vm304_vm2, %v1206_v41 }
 0x50f   :  { %2478 = vmatprep.mubr.msk.f32.mxu1 %vm2739_vm1, %v2738_v12 }
 0x5c2   :  { %v885_v43 = vpop.f32.mrf.mxu0 }
 0x5c3   :  { %2453 = vmatprep.mubr.msk.f32.mxu0 %vm304_vm2, %v885_v43 }
 0x5c4   :  { %v2445_v44 = vpop.f32.mrf.mxu0 }
 0x5c6   :  { %v961_v45 = vpop.f32.mrf.mxu1 }
 0x5c7   :  { %2454 = vmatmul.mubr.msk.f32.vlgmr.msra.gmra.mxu0 %vm304_vm2, %v961_v45 }
 0x5c8   :  { %2462 = vmatpush3.xpose.msk.msra.mxu0 %vm304_vm2, %v1130_v37  ;;  %v2450_v46 = vpop.f32.mrf.mxu1  ;;  %2463 = vmatprep.mubr.msk.f32.mxu0 %vm2739_vm1, %v2738_v12 }
 0x5c9   :  { %2471 = vmatprep.subr.mxu0 %v2738_v12 }
 0x5ca   :  { %v2998_v48 = vpop.f32.mrf.mxu1 }
 0x5cb   :  { %2464 = vmatmul.mubr.msk.f32.vlgmr.msra.gmra.mxu0 %vm304_vm2, %v1128_v47 }
 0x5cc   :  { %v3001_v49 = vpop.f32.mrf.mxu1  ;;  %2473 = vmatprep.mubr.msk.f32.mxu0 %vm2739_vm1, %v2738_v12 }
 0x5ce   :  { %v1279_v50 = vpop.f32.mrf.mxu1 }
 0x5cf   :  { %v1280_v51 = vadd.f32 %v2919_v34, %v1279_v50 }
 0x5d0   :  { %v2470_v52 = vpop.f32.mrf.mxu1 }
 0x5d1   :  { %v1286_v53 = vsel %vm304_vm2, %v1280_v51, -inf }
 0x5d2   :  { %1287 = vmax.xlane.f32.xlu1 %v1286_v53 }
 0x5e3   :  { %1383 = vrot.lane.b32.xlu1 %v2887_v21, %s2744_s30 }
 0x5e7   :  { %1544 = vrot.lane.b32.xlu1 %v2889_v25, %s2745_s13 }
 0x5eb   :  { %1622 = vrot.lane.b32.xlu1 %v2887_v21, %s2745_s13 }
 0x5ef   :  { %1620 = vrot.lane.b32.xlu1 %v2906_v28, %s2745_s13 }
 0x65b   :  { %v1288_v54 = vpop.xlane.xlu1 %1287 }
 0x65c   :  { %v1290_v57 = vsub.f32 %v1280_v51, %v1288_v54 }
 0x65e   :  { %v1293_v59 = vmul.f32 1.442695, %v1290_v57 }
 0x65f   :  { %v1384_v55 = vpop.permute.xlu1 %1383 }
 0x660   :  { %2477 = vmatpush3.msra.mxu1 %v1384_v55  ;;  %2576 = vpow2.f32 %v1293_v59 }
 0x661   :  { %2486 = vmatprep.subr.mxu1 %v2738_v12 }
 0x663   :  { %v1545_v17 = vpop.permute.xlu1 %1544 }
 0x667   :  { %v1623_v56 = vpop.permute.xlu1 %1622 }
 0x66b   :  { %v1621_v39 = vpop.permute.xlu1 %1620 }
 0x66d   :  { %v2577_v2 = vpop.eup %2576 }
 0x66e   :  { %v1298_v28 = vsel %vm304_vm2, %v2577_v2, 0.0 }
 0x687   :  { %v3016_v60 = vpop.f32.mrf.mxu0 }
 0x688   :  { %v1124_v44 = vadd.f32 %v2998_v48, %v3016_v60 }
 0x689   :  { %v3018_v61 = vpop.f32.mrf.mxu0 }
 0x68a   :  { %v1119_v46 = vadd.f32 %v3001_v49, %v3018_v61 }
 0x68b   :  { %v1201_v62 = vpop.f32.mrf.mxu0 }
 0x68c   :  { %v1202_v63 = vadd.f32 %v2916_v30, %v1201_v62 }
 0x68d   :  { %v2465_v0 = vpop.f32.mrf.mxu0 }
 0x68e   :  { %v1283_v1 = vsel %vm304_vm2, %v1202_v63, -inf }
 0x68f   :  { %1284 = vmax.xlane.f32.xlu0 %v1283_v1 }
 0x693   :  { %1299 = vadd.xlane.f32.xlu0 %v1298_v28 }
 0x718   :  { %v1285_v3 = vpop.xlane.xlu0 %1284 }
 0x719   :  { %v1289_v4 = vsub.f32 %v1202_v63, %v1285_v3 }
 0x71b   :  { %v1291_v5 = vmul.f32 1.442695, %v1289_v4 }
 0x71c   :  { %v1300_v6 = vpop.xlane.xlu0 %1299 }
 0x71d   :  { %2578 = vpow2.f32 %v1291_v5  ;;  %v291_v5 = vld [vmem:[%s3148_s5 + $0x18] sm:$0xff] }
 0x71e   :  { %2580 = vrcp.f32 %v1300_v6 }
 0x72a   :  { %v2579_v7 = vpop.eup %2578 }
 0x72b   :  { %v2581_v9 = vpop.eup %2580  ;;  %v1295_v11 = vsel %vm304_vm2, %v2579_v7, 0.0 }
 0x72c   :  { %1296 = vadd.xlane.f32.xlu0 %v1295_v11  ;;  %v1304_v13 = vmul.f32 %v2581_v9, %v2577_v2  ;;  %v1963_v11 = vsub.s32 1, %v2875_v14 }
 0x72e   :  { %2479 = vmatmul.mubr.msk.f32.vlgmr.msra.gmra.mxu1 %vm304_vm2, %v1304_v13  ;;  %v3027_v18 = vadd.f32 %v1304_v13, %v812_v15  ;;  %v1964_v13 = vrot.slane %v2881_v16, %v1963_v11 }
 0x72f   :  { %2487 = vmatpush3.xpose.msk.msra.mxu1 %vm304_vm2, %v1545_v17  ;;  %2488 = vmatprep.mubr.msk.f32.mxu1 %vm2739_vm1, %v2738_v12 }
 0x730   :  { %2496 = vmatprep.subr.mxu1 %v2738_v12 }
 0x742   :  { %1307 = vrot.lane.b32.xlu0 %v2889_v25, %s2744_s30 }
 0x746   :  { %1542 = vrot.lane.b32.xlu0 %v2893_v26, %s2745_s13 }
 0x7b5   :  { %v1297_v19 = vpop.xlane.xlu0 %1296 }
 0x7b6   :  { %2582 = vrcp.f32 %v1297_v19 }
 0x7b9   :  { %v1308_v58 = vpop.permute.xlu0 %1307 }
 0x7ba   :  { %2472 = vmatpush3.msra.mxu0 %v1308_v58 }
 0x7bb   :  { %2481 = vmatprep.subr.mxu0 %v290_v31 }
 0x7bd   :  { %v1543_v20 = vpop.permute.xlu0 %1542 }
 0x7be   :  { %2489 = vmatmul.mubr.msk.f32.vlgmr.msra.gmra.mxu1 %vm304_vm2, %v1543_v20 }
 0x7bf   :  { %2498 = vmatprep.mubr.msk.f32.mxu1 %vm2739_vm1, %v2738_v12 }
 0x7c3   :  { %v2583_v22 = vpop.eup %2582 }
 0x7c4   :  { %v1303_v23 = vmul.f32 %v2583_v22, %v2579_v7 }
 0x7c6   :  { %2474 = vmatmul.mubr.msk.f32.vlgmr.msra.gmra.mxu0 %vm304_vm2, %v1303_v23  ;;  %v1305_v27 = vadd.f32 %v1303_v23, %v811_v24 }
 0x7c7   :  { %2482 = vmatpush3.msra.mxu0 %v290_v31 }
 0x7c8   :  { %2491 = vmatprep.subr.mxu0 %v2738_v12 }
 0x7ee   :  { %v1455_v29 = vpop.f32.mrf.mxu1 }
 0x7f0   :  { %v2480_v26 = vpop.f32.mrf.mxu1 }
 0x87e   :  { %v1616_v32 = vpop.f32.mrf.mxu1 }
 0x87f   :  { %v1617_v33 = vadd.f32 %v2916_v30, %v1616_v32 }
 0x880   :  { %v2490_v35 = vpop.f32.mrf.mxu1 }
 0x881   :  { %v1698_v37 = vsel %vm304_vm2, %v1617_v33, -inf }
 0x882   :  { %1699 = vmax.xlane.f32.xlu0 %v1698_v37 }
 0x886   :  { %v1379_v36 = vpop.f32.mrf.mxu0 }
 0x887   :  { %2483 = vmatprep.mubr.msk.f32.mxu0 %vm304_vm2, %v1379_v36 }
 0x888   :  { %v2475_v38 = vpop.f32.mrf.mxu0  ;;  %2484 = vmatmul.mubr.msk.f32.vlgmr.msra.gmra.mxu0 %vm304_vm2, %v1455_v29 }
 0x889   :  { %2492 = vmatpush3.xpose.msk.msra.mxu0 %vm304_vm2, %v1623_v56  ;;  %2493 = vmatprep.mubr.msk.f32.mxu0 %vm2739_vm1, %v2738_v12  ;;  %v2011_v38 = vld [vmem:[#allocation8 + $0x18] sm:$0xff] }
 0x88a   :  { %2501 = vmatprep.subr.mxu0 %v2738_v12 }
 0x88c   :  { %2494 = vmatmul.mubr.msk.f32.vlgmr.msra.gmra.mxu0 %vm304_vm2, %v1621_v39  ;;  %v2009_v39 = vld [vmem:[#allocation8 + $0x8] sm:$0xff] }
 0x88d   :  { %2503 = vmatprep.mubr.msk.f32.mxu0 %vm2739_vm1, %v2738_v12 }
 0x90b   :  { %v1700_v30 = vpop.xlane.xlu0 %1699 }
 0x90c   :  { %v1704_v40 = vsub.f32 %v1617_v33, %v1700_v30  ;;  %v2008_v30 = vld [vmem:[#allocation8] sm:$0xff] }
 0x90e   :  { %v1706_v41 = vmul.f32 1.442695, %v1704_v40  ;;  %v2109_v40 = vld [vmem:[%s3150_s7 + $0x38] sm:$0xff] }
 0x910   :  { %2584 = vpow2.f32 %v1706_v41  ;;  %v2108_v41 = vld [vmem:[%s3150_s7 + $0x30] sm:$0xff] }
 0x91d   :  { %v2585_v42 = vpop.eup %2584 }
 0x91e   :  { %v1710_v43 = vsel %vm304_vm2, %v2585_v42, 0.0 }
 0x91f   :  { %1711 = vadd.xlane.f32.xlu0 %v1710_v43  ;;  %v2106_v43 = vld [vmem:[%s3150_s7 + $0x20] sm:$0xff] }
 0x948   :  { %v2485_v45 = vpop.f32.mrf.mxu0 }
 0x949   :  { %v1541_v47 = vadd.f32 %v2485_v45, %v1124_v44 }
 0x94a   :  { %v1531_v50 = vpop.f32.mrf.mxu0 }
 0x94b   :  { %v1540_v51 = vadd.f32 %v1531_v50, %v1119_v46 }
 0x94c   :  { %v1694_v52 = vpop.f32.mrf.mxu0 }
 0x94d   :  { %v1695_v12 = vadd.f32 %v2919_v34, %v1694_v52  ;;  %v1998_v52 = vsub.s32 3, %v2875_v14 }
 0x94e   :  { %v2495_v53 = vpop.f32.mrf.mxu0 }
 0x94f   :  { %v1701_v54 = vsel %vm304_vm2, %v1695_v12, -inf  ;;  %v1999_v53 = vrot.slane %v2881_v16, %v1998_v52 }
 0x950   :  { %1702 = vmax.xlane.f32.xlu1 %v1701_v54  ;;  %v2004_v54 = vsub.s32 4, %v2875_v14 }
 0x961   :  { %1798 = vrot.lane.b32.xlu1 %v2887_v21, %s2746_s15 }
 0x9a8   :  { %v1712_v55 = vpop.xlane.xlu0 %1711 }
 0x9a9   :  { %2586 = vrcp.f32 %v1712_v55 }
 0x9b6   :  { %v2587_v48 = vpop.eup %2586 }
 0x9b7   :  { %v1718_v57 = vmul.f32 %v2587_v48, %v2585_v42  ;;  %v2107_v42 = vld [vmem:[%s3150_s7 + $0x28] sm:$0xff] }
 0x9b9   :  { %v1720_v59 = vadd.f32 %v1718_v57, %v1305_v27 }
 0x9bb   :  { %v1957_v60 = vmul.f32 0.25, %v1720_v59 }
 0x9bd   :  { %1959 = vst.msk [vmem:[#allocation11] sm:$0xff] %vm304_vm2, %v1957_v60  ;;  %v2005_v60 = vrot.slane %v2881_v16, %v2004_v54 }
 0x9d9   :  { %v1703_v49 = vpop.xlane.xlu1 %1702 }
 0x9da   :  { %v1705_v61 = vsub.f32 %v1695_v12, %v1703_v49 }
 0x9dc   :  { %v1708_v62 = vmul.f32 1.442695, %v1705_v61 }
 0x9dd   :  { %v1799_v63 = vpop.permute.xlu1 %1798 }
 0x9de   :  { %2588 = vpow2.f32 %v1708_v62  ;;  %2502 = vmatpush3.msra.mxu0 %v1799_v63  ;;  %v2105_v63 = vld [vmem:[%s3150_s7 + $0x18] sm:$0xff] }
 0x9df   :  { %2511 = vmatprep.subr.mxu0 %v2011_v38 }
 0x9eb   :  { %v2589_v34 = vpop.eup %2588 }
 0x9ec   :  { %v1713_v0 = vsel %vm304_vm2, %v2589_v34, 0.0 }
 0x9ed   :  { %1714 = vadd.xlane.f32.xlu0 %v1713_v0  ;;  %v2103_v0 = vld [vmem:[%s3150_s7 + $0x8] sm:$0xff] }
 0xa03   :  { %1722 = vrot.lane.b32.xlu0 %v2889_v25, %s2746_s15 }
 0xa76   :  { %v1715_v21 = vpop.xlane.xlu0 %1714 }
 0xa77   :  { %2590 = vrcp.f32 %v1715_v21  ;;  %v2102_v21 = vld [vmem:[%s3150_s7] sm:$0xff] }
 0xa7a   :  { %v1723_v1 = vpop.permute.xlu0 %1722 }
 0xa7b   :  { %2497 = vmatpush3.msra.mxu1 %v1723_v1  ;;  %v2312_v1 = vld [vmem:[%s3153_s10] ss:$0 sm:$0xff] }
 0xa7c   :  { %2499 = vmatmul.mubr.msk.f32.vlgmr.msra.gmra.mxu1 %vm304_vm2, %v1718_v57  ;;  %2506 = vmatprep.subr.mxu1 %v291_v5 }
 0xa7d   :  { %2507 = vmatpush3.msra.mxu1 %v291_v5 }
 0xa7e   :  { %2522 = vmatprep.subr.mxu1 %v2109_v40 }
 0xa84   :  { %v2591_v2 = vpop.eup %2590 }
 0xa85   :  { %v1719_v28 = vmul.f32 %v2591_v2, %v2589_v34  ;;  %v2104_v34 = vld [vmem:[%s3150_s7 + $0x10] sm:$0xff]  ;;  %s2747_s7 = smov [#allocation11]  }
 0xa86   :  { %s2255_s10 = sshll.u32 %s2747_s7, 4  ;;  %s2256_s10 = int_to_ptr.vmem [resolvable:$true] %s2255_s10 }
 0xa87   :  { %2504 = vmatmul.mubr.msk.f32.vlgmr.msra.gmra.mxu0 %vm304_vm2, %v1719_v28  ;;  %v1721_v3 = vadd.f32 %v1719_v28, %v3027_v18  ;;  %s2680_s30 = scalar_lea.vmem %s2256_s10, 256  ;;  %p2685_p7 = scmp.lt.s32.totalorder %s2256_s10, %s2256_s10 }
 0xa88   :  { %2512 = vmatpush3.msra.mxu0 %v2011_v38  ;;  %p2681_p6 = scmp.ne.s32.totalorder %s2256_s10, %s2680_s30  ;;  %p2686_p8 = scmp.lt.s32.totalorder %s2680_s30, %s2680_s30 }
 0xa89   :  { %v1958_v4 = vmul.f32 0.25, %v1721_v3 }
 0xa8a   :  { %p2687_p9 = por %p2686_p8, %p2685_p7 }
 0xa8b   :  { %1960 = vst.msk [vmem:[#allocation11 + $0x8] sm:$0xff] %vm304_vm2, %v1958_v4 }
 0xa8c   :  { %p2688_p10 = pnand %p2687_p9, %p2681_p6 }
 0xb3c   :  { %v1794_v25 = vpop.f32.mrf.mxu1 }
 0xb3d   :  { %2508 = vmatprep.mubr.msk.f32.mxu1 %vm304_vm2, %v1794_v25 }
 0xb3e   :  { %v2500_v6 = vpop.f32.mrf.mxu1 }
 0xb3f   :  { %v2112_v6 = vsub.s32 2, %v2875_v14 }
 0xb47   :  { %v1870_v7 = vpop.f32.mrf.mxu0 }
 0xb48   :  { %2509 = vmatmul.mubr.msk.f32.vlgmr.msra.gmra.mxu1 %vm304_vm2, %v1870_v7  ;;  %v2113_v7 = vrot.slane %v2881_v16, %v2112_v6 }
 0xb49   :  { %v2505_v9 = vpop.f32.mrf.mxu0  ;;  %2523 = vmatpush3.msra.mxu1 %v2109_v40 }
 0xb4a   :  { %2524 = vmatprep.subr.mxu1 %v2108_v41 }
 0xb4b   :  { %2525 = vmatpush3.msra.mxu1 %v2108_v41 }
 0xb4c   :  { %2526 = vmatprep.subr.mxu1 %v2107_v42 }
 0xb4d   :  { %2527 = vmatpush3.msra.mxu1 %v2107_v42 }
 0xb4e   :  { %2528 = vmatprep.subr.mxu1 %v2106_v43 }
 0xb4f   :  { %2529 = vmatpush3.msra.mxu1 %v2106_v43 }
 0xb50   :  { %2530 = vmatprep.subr.mxu1 %v2105_v63 }
 0xb51   :  { %2531 = vmatpush3.msra.mxu1 %v2105_v63 }
 0xb52   :  { %2532 = vmatprep.subr.mxu1 %v2104_v34 }
 0xb53   :  { %2533 = vmatpush3.msra.mxu1 %v2104_v34 }
 0xb54   :  { %2534 = vmatprep.subr.mxu1 %v2103_v0 }
 0xb55   :  { %2535 = vmatpush3.msra.mxu1 %v2103_v0 }
 0xb56   :  { %2536 = vmatprep.subr.mxu1 %v2102_v21 }
 0xb57   :  { %2537 = vmatpush3.msra.mxu1 %v2102_v21 }
 0xc08   :  { %v2510_v15 = vpop.f32.mrf.mxu1 }
 0xc09   :  { %v1956_v17 = vadd.f32 %v2510_v15, %v1541_v47 }
 0xc0a   :  { %v1946_v18 = vpop.f32.mrf.mxu1 }
 0xc0b   :  { %v1966_v19 = vadd.f32 %v1964_v13, %v1956_v17  ;;  %v1955_v58 = vadd.f32 %v1946_v18, %v1540_v51 }
 0xc0d   :  { %v1965_v20 = vadd.f32 %v1964_v13, %v1955_v58  ;;  %v1968_v22 = vadd.f32 %v1966_v19, %v2861_v10 }
 0xc0f   :  { %v1972_v23 = vsel %vm112_vm0, %v1968_v22, 0.0  ;;  %v1967_v24 = vadd.f32 %v1965_v20, %v2859_v8  ;;  %v2010_v8 = vld [vmem:[#allocation8 + $0x10] sm:$0xff] }
 0xc10   :  { %1973 = vadd.xlane.f32.xlu0 %v1972_v23  ;;  %2513 = vmatprep.subr.mxu0 %v2010_v8 }
 0xc11   :  { %v1969_v27 = vsel %vm112_vm0, %v1967_v24, 0.0  ;;  %2514 = vmatpush3.msra.mxu0 %v2010_v8 }
 0xc12   :  { %1970 = vadd.xlane.f32.xlu1 %v1969_v27  ;;  %2515 = vmatprep.subr.mxu0 %v2009_v39 }
 0xc13   :  { %2516 = vmatpush3.msra.mxu0 %v2009_v39 }
 0xc14   :  { %2517 = vmatprep.subr.mxu0 %v2008_v30 }
 0xc15   :  { %2518 = vmatpush3.msra.mxu0 %v2008_v30 }
 0xc99   :  { %v1974_v29 = vpop.xlane.xlu0 %1973 }
 0xc9a   :  { %v1977_v26 = vmul.f32 0.03125, %v1974_v29 }
 0xc9b   :  { %v1971_v31 = vpop.xlane.xlu1 %1970 }
 0xc9c   :  { %v1979_v32 = vsub.f32 %v1968_v22, %v1977_v26  ;;  %v1976_v33 = vmul.f32 0.03125, %v1971_v31 }
 0xc9e   :  { %v1978_v35 = vsub.f32 %v1967_v24, %v1976_v33  ;;  %v1981_v37 = vmul.f32 %v1979_v32, %v1979_v32 }
 0xca0   :  { %v1985_v56 = vsel %vm112_vm0, %v1981_v37, 0.0  ;;  %v1980_v36 = vmul.f32 %v1978_v35, %v1978_v35 }
 0xca1   :  { %1986 = vadd.xlane.f32.xlu1 %v1985_v56 }
 0xca2   :  { %v1982_v10 = vsel %vm112_vm0, %v1980_v36, 0.0 }
 0xca3   :  { %1983 = vadd.xlane.f32.xlu0 %v1982_v10 }
 0xd2a   :  { %v1987_v44 = vpop.xlane.xlu1 %1986 }
 0xd2b   :  { %v1989_v45 = vmul.f32 0.03125, %v1987_v44 }
 0xd2c   :  { %v1984_v46 = vpop.xlane.xlu0 %1983 }
 0xd2d   :  { %v1991_v47 = vadd.f32 1e-05, %v1989_v45  ;;  %v1988_v50 = vmul.f32 0.03125, %v1984_v46 }
 0xd2f   :  { %2592 = vrsqrt.f32 %v1991_v47  ;;  %v1990_v51 = vadd.f32 1e-05, %v1988_v50 }
 0xd31   :  { %2594 = vrsqrt.f32 %v1990_v51 }
 0xd3c   :  { %v2593_v12 = vpop.eup %2592 }
 0xd3d   :  { %v1995_v55 = vmul.f32 %v2593_v12, %v1979_v32 }
 0xd3e   :  { %v2595_v48 = vpop.eup %2594 }
 0xd3f   :  { %v1994_v57 = vmul.f32 %v2595_v48, %v1978_v35  ;;  %v2001_v59 = vmul.f32 %v1999_v53, %v1995_v55 }
 0xd41   :  { %v2000_v49 = vmul.f32 %v1999_v53, %v1994_v57  ;;  %v2007_v62 = vadd.f32 %v2005_v60, %v2001_v59 }
 0xd43   :  { %v2006_v61 = vadd.f32 %v2005_v60, %v2000_v49 }
 0xd45   :  { %2519 = vmatprep.mubr.msk.f32.mxu0 %vm112_vm0, %v2006_v61 }
 0xd46   :  { %2520 = vmatmul.mubr.msk.f32.vlgmr.msra.gmra.mxu0 %vm112_vm0, %v2007_v62 }
 0xe06   :  { %v2521_v2 = vpop.f32.mrf.mxu0 }
 0xe07   :  { %v2097_v28 = vadd.f32 %v2521_v2, %v2312_v1 }
 0xe08   :  { %v2091_v3 = vpop.f32.mrf.mxu0 }
 0xe09   :  { %v2092_v4 = vadd.f32 %v2312_v1, %v2091_v3  ;;  %v2101_v25 = vmax.f32 %v2097_v28, 0.0 }
 0xe0b   :  { %v2100_v5 = vmax.f32 %v2092_v4, 0.0 }
 0xe0d   :  { %2538 = vmatprep.mubr.msk.f32.mxu1 %vm2114_vm3, %v2100_v5 }
 0xe0e   :  { %2539 = vmatmul.mubr.msk.f32.vlgmr.msra.gmra.mxu1 %vm2114_vm3, %v2101_v25 }
 0xece   :  { %v2540_v9 = vpop.f32.mrf.mxu1 }
 0xecf   :  { %v2193_v11 = vadd.f32 %v2540_v9, %v2113_v7 }
 0xed0   :  { %v2187_v13 = vpop.f32.mrf.mxu1 }
 0xed1   :  { %v2188_v15 = vadd.f32 %v2187_v13, %v2113_v7  ;;  %v2197_v17 = vadd.f32 %v2193_v11, %v2007_v62 }
 0xed3   :  { %v2201_v18 = vsel %vm112_vm0, %v2197_v17, 0.0  ;;  %v2196_v19 = vadd.f32 %v2188_v15, %v2006_v61 }
 0xed4   :  { %2202 = vadd.xlane.f32.xlu1 %v2201_v18 }
 0xed5   :  { %v2198_v58 = vsel %vm112_vm0, %v2196_v19, 0.0 }
 0xed6   :  { %2199 = vadd.xlane.f32.xlu0 %v2198_v58 }
 0xf5d   :  { %v2203_v20 = vpop.xlane.xlu1 %2202 }
 0xf5e   :  { %v2205_v22 = vmul.f32 0.03125, %v2203_v20 }
 0xf5f   :  { %v2200_v23 = vpop.xlane.xlu0 %2199 }
 0xf60   :  { %v2207_v24 = vsub.f32 %v2197_v17, %v2205_v22  ;;  %v2204_v27 = vmul.f32 0.03125, %v2200_v23 }
 0xf62   :  { %v2206_v29 = vsub.f32 %v2196_v19, %v2204_v27  ;;  %v2209_v26 = vmul.f32 %v2207_v24, %v2207_v24 }
 0xf64   :  { %v2213_v31 = vsel %vm112_vm0, %v2209_v26, 0.0  ;;  %v2208_v32 = vmul.f32 %v2206_v29, %v2206_v29 }
 0xf65   :  { %2214 = vadd.xlane.f32.xlu1 %v2213_v31 }
 0xf66   :  { %v2210_v33 = vsel %vm112_vm0, %v2208_v32, 0.0 }
 0xf67   :  { %2211 = vadd.xlane.f32.xlu0 %v2210_v33 }
 0xf68   :  { %2691 = shalt.err (!%p2688_p10)
}
 0xf69   :  { %2261 = dma.vmem_to_hbm [thread:$0]  %s2256_s10, 256, %s3155_s12, [#allocation12], %s2732_s26, %s2732_s26, %s2733_s27   ;;  %v2226_v8 = vsub.s32 5, %v2875_v14  ;;  %v2232_v39 = vsub.s32 6, %v2875_v14 }
 0xf6a   :  { %s2748_s12 = smov [#allocation10]  }
 0xf6b   :  { %v2227_v30 = vrot.slane %v2881_v16, %v2226_v8  ;;  %v2233_v42 = vrot.slane %v2881_v16, %v2232_v39  ;;  %s2243_s14 = sshll.u32 %s2748_s12, 4  ;;  %s2244_s14 = int_to_ptr.vmem [resolvable:$true] %s2243_s14 }
 0xf6c   :  { %s2700_s15 = scalar_lea.vmem %s2244_s14, 256  ;;  %p2705_p12 = scmp.lt.s32.totalorder %s2244_s14, %s2244_s14 }
 0xf6d   :  { %p2701_p11 = scmp.ne.s32.totalorder %s2244_s14, %s2700_s15  ;;  %p2706_p13 = scmp.lt.s32.totalorder %s2700_s15, %s2700_s15 }
 0xf6f   :  { %p2707_p0 = por %p2706_p13, %p2705_p12 }
 0xf71   :  { %p2708_p1 = pnand %p2707_p0, %p2701_p11 }
 0xfee   :  { %v2215_v35 = vpop.xlane.xlu1 %2214 }
 0xfef   :  { %v2217_v37 = vmul.f32 0.03125, %v2215_v35 }
 0xff0   :  { %v2212_v56 = vpop.xlane.xlu0 %2211 }
 0xff1   :  { %v2219_v36 = vadd.f32 1e-05, %v2217_v37  ;;  %v2216_v10 = vmul.f32 0.03125, %v2212_v56 }
 0xff3   :  { %2596 = vrsqrt.f32 %v2219_v36  ;;  %v2218_v38 = vadd.f32 1e-05, %v2216_v10 }
 0xff5   :  { %2598 = vrsqrt.f32 %v2218_v38 }
0x1000   :  { %v2597_v40 = vpop.eup %2596 }
0x1001   :  { %v2223_v41 = vmul.f32 %v2597_v40, %v2207_v24 }
0x1002   :  { %v2599_v43 = vpop.eup %2598 }
0x1003   :  { %v2222_v44 = vmul.f32 %v2599_v43, %v2206_v29  ;;  %v2229_v45 = vmul.f32 %v2227_v30, %v2223_v41 }
0x1005   :  { %v2228_v46 = vmul.f32 %v2227_v30, %v2222_v44  ;;  %v2235_v47 = vadd.f32 %v2233_v42, %v2229_v45 }
0x1007   :  { %v2234_v50 = vadd.f32 %v2233_v42, %v2228_v46  ;;  %2237 = vst.msk [vmem:[#allocation10 + $0x8] sm:$0xff] %vm112_vm0, %v2235_v47 }
0x1009   :  { %2236 = vst.msk [vmem:[#allocation10] sm:$0xff] %vm112_vm0, %v2234_v50 }
0x100a   :  { %2711 = shalt.err (!%p2708_p1)
}
0x100b   :  { %2249 = dma.vmem_to_hbm [thread:$0]  %s2244_s14, 256, %s3154_s11, [#allocation4], %s2732_s26, %s2732_s26, %s2733_s27  }
0x100c   :  { %2726 = dma.done.wait [#allocation4], 256  }
0x100d   :  { %2727 = vsyncadd [#allocation4], 4294967040 }
0x100e   :  { %2728 = dma.done.wait [#allocation12], 256  }
0x100f   :  { %2729 = vsyncadd [#allocation12], 4294967040 }
0x1010   :  { %2268 = vsyncpa [#allocation3], 1 }
0x1011   :  { %2269 = vsyncpa [#allocation6], 1 }
0x1012   :  { %2270 = vsyncpa [#allocation9], 1 }
0x1013   :  { %2271 = vsyncpa [#allocation4], 1 }
0x1014   :  { %2272 = vsyncpa [#allocation12], 1 }

</bundles_post_ra>
